<compile_context>
chip_gen: v7x
topology: tpu7x:2x2x1
jax: 0.10.0
libtpu: 0.0.40
codegen_flags: <defaults>
</compile_context>

<pallas_src>
import jax
import jax.numpy as jnp
from jax.experimental import pallas as pl
from jax.experimental.pallas import tpu as pltpu  # noqa: F401  (TPU backend)


def fs_conv_kernel(zg_ref, w_ref, b_ref, o_ref):
    # zg_ref: [D', T]  Z already nearest-gathered along time (trace-time idx)
    # w_ref:  [C, D']  nn.Conv1d weight[:, :, 0]
    # b_ref:  [C, 1]
    # o_ref:  [C, T]   lane-dense output (matches PyTorch [1, C, T] sans batch)
    o_ref[...] = (
        jnp.dot(w_ref[...], zg_ref[...], preferred_element_type=jnp.float32)
        + b_ref[...]
    ).astype(o_ref.dtype)


def fs_conv_forward(Z, W, b, T):
    """Z: [1, D', T'] f32, W: [C, D'] f32 (Conv1d weight squeezed), b: [C] f32
       ->  [1, C, T] f32   (same as Conv.forward in the PyTorch module)."""
    assert Z.shape[0] == 1, "Fs module operates on batch size 1"
    _, Dp, Tp = Z.shape
    C = W.shape[0]

    # Nearest interpolation (PyTorch F.interpolate default 'nearest'):
    #   src(t) = floor(t * T'/T), t in [0, T)   (clamp is a no-op but cheap).
    # Static shapes -> computed once at trace time; gather Z columns in the
    # wrapper so the kernel is a single channel matmul + bias.
    idx = jnp.asarray([min((t * Tp) // T, Tp - 1) for t in range(T)],
                      dtype=jnp.int32)

    Z2 = Z.reshape(Dp, Tp)            # drop batch-1 dim (free; NOT a transpose)
    Zg = jnp.take(Z2, idx, axis=1)    # [D', T] nearest-gathered input
    b2 = b.reshape(C, 1)

    cost = pl.CostEstimate(
        flops=2 * C * Dp * T,
        transcendentals=0,
        bytes_accessed=4 * (Dp * T + C * Dp + C + C * T),
    )

    out_ct = pl.pallas_call(
        fs_conv_kernel,
        out_shape=jax.ShapeDtypeStruct((C, T), jnp.float32),
        cost_estimate=cost,
        # no grid: whole-array VMEM blocks, single invocation — the op is
        # launch/DMA-overhead bound, any tiling would only add per-step cost.
    )(Zg, W, b2)

    return out_ct[None]               # [1, C, T]


if __name__ == "__main__":
    # Small shapes implied by the module: Z is [1, hidden_size, T'], output [1, C, T]
    hidden_size = 32   # cfg.model.fs.hidden_size  (D')
    num_classes = 8    # C
    T_prime = 16       # intermediate temporal length T'
    T = 24             # target video temporal length

    key = jax.random.PRNGKey(0)
    kz, kw, kb = jax.random.split(key, 3)

    Z = jax.random.normal(kz, (1, hidden_size, T_prime), dtype=jnp.float32)
    # nn.Conv1d(hidden, C, 1).weight has shape [C, hidden, 1]; W = weight[:, :, 0].
    W = jax.random.normal(kw, (num_classes, hidden_size), dtype=jnp.float32) * 0.1
    b = jax.random.normal(kb, (num_classes,), dtype=jnp.float32) * 0.1

    out = fs_conv_forward(Z, W, b, T)
    out = jax.block_until_ready(out)
    assert out.shape == (1, num_classes, T)

    # pure-JAX reference: conv1x1 then nearest interpolation
    S_ref = jnp.einsum("cd,dt->ct", W, Z[0]) + b[:, None]           # [C, T']
    idx_ref = jnp.minimum((jnp.arange(T) * T_prime) // T, T_prime - 1)
    ref = jnp.take(S_ref, idx_ref, axis=1)[None]                    # [1, C, T]
    assert jnp.allclose(out, ref, atol=1e-5, rtol=1e-5)

    print("KERNEL_OK")
</pallas_src>

<mosaic_0001>
module attributes {stable_mosaic.version = 11 : i64} {
  func.func @fs_conv_kernel(%arg0: memref<32x24xf32, #tpu.memory_space<vmem>>, %arg1: memref<8x32xf32, #tpu.memory_space<vmem>>, %arg2: memref<8x1xf32, #tpu.memory_space<vmem>>, %arg3: memref<8x24xf32, #tpu.memory_space<vmem>>) attributes {dimension_semantics = [], scalar_prefetch = 0 : i64, scratch_operands = 0 : i64, tpu.core_type = #tpu.core_type<tc>} {
    %c0 = arith.constant 0 : index
    %c0_0 = arith.constant 0 : index
    %0 = vector.load %arg1[%c0, %c0_0] : memref<8x32xf32, #tpu.memory_space<vmem>>, vector<8x32xf32>
    %c0_1 = arith.constant 0 : index
    %c0_2 = arith.constant 0 : index
    %1 = vector.load %arg0[%c0_1, %c0_2] : memref<32x24xf32, #tpu.memory_space<vmem>>, vector<32x24xf32>
    %cst = arith.constant dense<0.000000e+00> : vector<8x24xf32>
    %2 = tpu.matmul %0, %1, %cst {dimension_numbers = #tpu.dot_dimension_numbers<[1], [0], [0], [1], [0, 0, 1, 1], [], []>} : vector<8x32xf32>, vector<32x24xf32>, vector<8x24xf32> -> vector<8x24xf32>
    %c0_3 = arith.constant 0 : index
    %c0_4 = arith.constant 0 : index
    %3 = vector.load %arg2[%c0_3, %c0_4] : memref<8x1xf32, #tpu.memory_space<vmem>>, vector<8x1xf32>
    %4 = vector.broadcast %3 : vector<8x1xf32> to vector<8x24xf32>
    %5 = arith.addf %2, %4 : vector<8x24xf32>
    %c0_5 = arith.constant 0 : index
    %c0_6 = arith.constant 0 : index
    %6 = vector.load %arg3[%c0_5, %c0_6] : memref<8x24xf32, #tpu.memory_space<vmem>>, vector<8x24xf32>
    tpu.vector_store %arg3[%c0_5, %c0_6], %5 {strides = array<i32>} : memref<8x24xf32, #tpu.memory_space<vmem>>, vector<8x24xf32>,
    return
  }
}

</mosaic_0001>

<bundles_post_ra>
// kernel: tpu_custom_call.1
= control target key start
LH: loop header
LB: loop body
LE: loop exit
PB: predicated region body
PF: predicated region fallthrough
CT: control target
= control target key end

     0   :  { %v169_v3 = vmov 0.0|0.0   ;;  %vm170_vm0 = vmmov 0   ;;  %v171_v6 = vmov 0.0   ;;  %v172_v8 = vmov 0   ;;  %s224_s0 = inlined_call_operand.vmem [shape: f32[32,24], index: 0, kind: input, shape index: {}]   ;;  %s225_s1 = inlined_call_operand.vmem [shape: f32[8,32], index: 1, kind: input, shape index: {}]   ;;  %s226_s2 = inlined_call_operand.vmem [shape: f32[8,1], index: 2, kind: input, shape index: {}]   ;;  %s227_s3 = inlined_call_operand.hbm [shape: f32[8,24], index: 3, kind: output, shape index: {}]  }
   0x1   :  { %v16_v0 = vld [vmem:[%s224_s0] sm:$0xff]  ;;  %v17_v1 = vld [vmem:[%s224_s0 + $0x8] sm:$0xff]  ;;  %v18_v2 = vld [vmem:[%s224_s0 + $0x10] sm:$0xff]  ;;  %133 = vmatprep.subr.bf16.mxu0 %v169_v3  ;;  %130 = vmatprep.mubr.msk.f32.mxu0 %vm170_vm0, %v171_v6 }
   0x2   :  { %v134_v4 = vpack.c.bf16 %v17_v1, %v16_v0  ;;  %v19_v5 = vld [vmem:[%s224_s0 + $0x18] sm:$0xff]  ;;  %v20_v7 = vld [vmem:[%s226_s2] sm:$0xff]  ;;  %144 = vset.pattern.permute.xlu0 %v172_v8 }
   0x3   :  { %8 = vsyncpa [#allocation3], 0  ;;  %v137_v9 = vpack.c.bf16 %v19_v5, %v18_v2  ;;  %23 = vperm.xlu0 %144, %v20_v7   ;;  %v15_v10 = vld [vmem:[%s225_s1] sm:$0xff]  ;;  %vm26_vm1 = vcmask 261120   ;;  %s173_s0 = smov [#allocation2]   ;;  %vm100_vm2 = vcmask 195584  }
   0x4   :  { %135 = vmatpush3.bf16.msra.mxu0 %v134_v4  ;;  %s108_s24 = sshll.u32 %s173_s0, 4  ;;  %s109_s24 = int_to_ptr.vmem [resolvable:$true] %s108_s24 }
   0x5   :  { %136 = vmatprep.subr.bf16.mxu0 %v169_v3  ;;  %s145_s2 = scalar_lea.vmem %s109_s24, 128  ;;  %p150_p1 = scmp.lt.s32.totalorder %s109_s24, %s109_s24 }
   0x6   :  { %p146_p0 = scmp.ne.s32.totalorder %s109_s24, %s145_s2  ;;  %p151_p2 = scmp.lt.s32.totalorder %s145_s2, %s145_s2 }
   0x8   :  { %138 = vmatpush3.bf16.msra.mxu0 %v137_v9  ;;  %p152_p3 = por %p151_p2, %p150_p1 }
   0xa   :  { %p153_p4 = pnand %p152_p3, %p146_p0 }
   0xb   :  { %131 = vmatmul.mubr.msk.f32.vlgmr.msra.gmra.mrb[0].mxu0 %vm26_vm1, %v15_v10 }
  0x82   :  { %v24_v11 = vpop.permute.xlu0 %23 }
  0xde   :  { %v96_v12 = vpop.f32.mrb[0].mxu0 }
  0xdf   :  { %v97_v13 = vadd.f32 %v96_v12, %v24_v11  ;;  %v132_v14 = vpop.f32.mrb[1].mxu0 }
  0xe1   :  { %101 = vst.msk [vmem:[#allocation2] sm:$0xff] %vm100_vm2, %v97_v13 }
  0xe2   :  { %156 = shalt.err (!%p153_p4)
}
  0xe3   :  { %s157_s26 = scalar_lea.hbm %s227_s3, 128 }
  0xe4   :  { %p158_p5 = scmp.ne.s32.totalorder %s227_s3, %s157_s26  ;;  %p161_p6 = scmp.lt.u32.totalorder %s157_s26, %s227_s3 }
  0xe6   :  { %p163_p7 = pnand %p161_p6, %p158_p5 }
  0xe8   :  { %166 = shalt.err (!%p163_p7)
}
  0xe9   :  { %111 = dma.vmem_to_hbm [thread:$0]  %s109_s24, 128, %s227_s3, [#allocation3]  }
  0xea   :  { %167 = dma.done.wait [#allocation3], 128  }
  0xeb   :  { %168 = vsyncadd [#allocation3], 4294967168 }
  0xec   :  { %115 = vsyncpa [#allocation3], 1 }

</bundles_post_ra>
